<compile_context>
chip_gen: v7x
topology: tpu7x:2x2x1
jax: 0.10.0
libtpu: 0.0.40
codegen_flags: <defaults>
</compile_context>

<pallas_src>
import math
from functools import partial

import jax
import jax.numpy as jnp
from jax.experimental import pallas as pl
from jax.experimental.pallas import tpu as pltpu

_MASK_VALUE = -1e30


def _vmem_limit_bytes() -> int:
    """Per-generation scoped-VMEM limit with headroom.

    v7x (64 MiB physical/TC) -> 48 MiB; v5e/v6e (128 MiB) -> 112 MiB.
    """
    mib = 1024 * 1024
    try:
        cap = int(pltpu.get_tpu_info().vmem_capacity_bytes)
    except Exception:
        cap = 128 * mib
    return int(min(max(cap - 16 * mib, 32 * mib), 112 * mib))


def _tile(n: int, target: int = 256) -> int:
    """Largest multiple-of-8 tile <= target that evenly divides n (else n)."""
    if n <= target:
        return n
    for cand in range(target, 7, -8):
        if n % cand == 0:
            return cand
    return n


def _head_block(bh_total: int, max_blk: int = 4) -> int:
    """Heads grouped per attention grid step (amortizes hd=64-wide DMAs)."""
    for cand in range(max_blk, 0, -1):
        if bh_total % cand == 0:
            return cand
    return 1


# ---------------------------------------------------------------------------
# Stage 1: fused qkv projection  (x @ w_qkv + b_qkv), bf16 operands, f32 accum.
# 1/sqrt(hd) attention scale is pre-folded into the q columns of w_qkv/b_qkv.
# ---------------------------------------------------------------------------
def _qkv_proj_kernel(x_ref, w_ref, b_ref, qkv_ref):
    acc = jnp.dot(x_ref[0], w_ref[...], preferred_element_type=jnp.float32)
    qkv_ref[0] = (acc + b_ref[0]).astype(qkv_ref.dtype)


# ---------------------------------------------------------------------------
# Stage 2: causal multi-head flash attention over a TRIANGULAR grid.
# grid = (B*n_head // h_blk, nq*(nq+1)/2); the second axis enumerates only the
# (qi, ki<=qi) tile pairs via scalar-prefetched tables, so no dead steps/DMAs.
# Requires tq == tk (diagonal-tile finalize + no fully-masked rows).
# ---------------------------------------------------------------------------
def _flash_attn_kernel(qi_tbl_ref, ki_tbl_ref, q_ref, k_ref, v_ref, o_ref,
                       m_sc, l_sc, acc_sc):
    t = pl.program_id(1)
    qi = qi_tbl_ref[t]
    ki = ki_tbl_ref[t]
    tq = q_ref.shape[1]
    tk = k_ref.shape[1]

    @pl.when(ki == 0)
    def _init():
        m_sc[...] = jnp.full(m_sc.shape, -jnp.inf, m_sc.dtype)
        l_sc[...] = jnp.zeros(l_sc.shape, l_sc.dtype)
        acc_sc[...] = jnp.zeros(acc_sc.shape, acc_sc.dtype)

    def _scores():
        # (h_blk,tq,hd) x (h_blk,tk,hd) -> (h_blk,tq,tk); 1/sqrt(hd) already
        # folded into q.
        return jnp.einsum("bqd,bkd->bqk", q_ref[...], k_ref[...],
                          preferred_element_type=jnp.float32)

    def _online_update(s):
        m_prev = m_sc[...]
        m_new = jnp.maximum(m_prev, s.max(axis=-1, keepdims=True))
        alpha = jnp.exp(m_prev - m_new)
        p = jnp.exp(s - m_new)
        l_sc[...] = alpha * l_sc[...] + p.sum(axis=-1, keepdims=True)
        acc_sc[...] = alpha * acc_sc[...] + jnp.einsum(
            "bqk,bkd->bqd", p.astype(v_ref.dtype), v_ref[...],
            preferred_element_type=jnp.float32)
        m_sc[...] = m_new

    # Interior tiles (ki < qi): fully below the causal diagonal -> no mask work.
    @pl.when(ki < qi)
    def _interior():
        _online_update(_scores())

    # Diagonal tile (ki == qi): local causal mask (tq == tk so offsets cancel),
    # update, then normalize and emit — this is the last kv tile for this row.
    @pl.when(ki == qi)
    def _diag_and_finalize():
        row = jax.lax.broadcasted_iota(jnp.int32, (tq, tk), 0)
        col = jax.lax.broadcasted_iota(jnp.int32, (tq, tk), 1)
        s = jnp.where(row >= col, _scores(), _MASK_VALUE)
        _online_update(s)
        inv_l = pl.reciprocal(l_sc[...], approx=True)
        o_ref[...] = (acc_sc[...] * inv_l).astype(o_ref.dtype)


# ---------------------------------------------------------------------------
# Stage 3: output projection + bias (+ optional residual add_tensor), consuming
# the context in head-major layout:  out = sum_h ctx_h @ w_proj_h + b (+ add).
# This removes the XLA head-major -> (B,S,H) transpose between stages 2 and 3.
# ---------------------------------------------------------------------------
def _out_proj_kernel(ctx_ref, w_ref, b_ref, *refs, n_head: int, has_add: bool):
    if has_add:
        add_ref, out_ref = refs
    else:
        (out_ref,) = refs
    tm = ctx_ref.shape[2]
    H = w_ref.shape[2]
    acc = jnp.zeros((tm, H), jnp.float32)
    for h in range(n_head):  # static unroll; each push is (tm,hd)@(hd,H) on MXU
        acc = acc + jnp.dot(ctx_ref[0, h], w_ref[h],
                            preferred_element_type=jnp.float32)
    acc = acc + b_ref[0]
    if has_add:
        acc = acc + add_ref[0]
    out_ref[0] = acc.astype(out_ref.dtype)


# ---------------------------------------------------------------------------
# One-time parameter prep (hoisted out of the per-call forward, per review).
# ---------------------------------------------------------------------------
def prepare_attn_params(params):
    n_head = int(params["n_head"])
    H = params["w_qkv"].shape[0]
    hd = H // n_head
    assert n_head * hd == H

    # Fold the 1/sqrt(hd) attention scale into the q columns of the fused qkv
    # projection; cast matmul operands to bf16 (accumulation stays f32 in-kernel).
    scale_cols = jnp.concatenate(
        [jnp.full((H,), 1.0 / math.sqrt(hd), jnp.float32),
         jnp.ones((2 * H,), jnp.float32)])
    w_qkv = (params["w_qkv"].astype(jnp.float32) * scale_cols).astype(jnp.bfloat16)
    b_qkv = (params["b_qkv"].astype(jnp.float32) * scale_cols).reshape(1, 3 * H)
    # w_proj rows grouped per head so stage 3 can consume head-major context.
    w_proj_h = params["w_proj"].astype(jnp.bfloat16).reshape(n_head, hd, H)
    b_proj = params["b_proj"].astype(jnp.float32).reshape(1, H)
    return dict(n_head=n_head, hd=hd, H=H, w_qkv=w_qkv, b_qkv=b_qkv,
                w_proj_h=w_proj_h, b_proj=b_proj)


def attn_wrapper_forward(x, prepped, add_tensor=None):
    """Pallas equivalent of AttnWrapper.forward.

    Returns (output, activations); activations mirrors the wrapper caching
    output[0] (hidden states after attention, plus add_tensor if given).
    """
    B, S, H = x.shape
    n_head, hd = prepped["n_head"], prepped["hd"]
    assert H == prepped["H"]

    vmem_limit = _vmem_limit_bytes()
    x_bf = x.astype(jnp.bfloat16)

    tm = _tile(S, 256)
    cp2 = pltpu.CompilerParams(dimension_semantics=("parallel", "parallel"),
                               vmem_limit_bytes=vmem_limit)

    # ---- stage 1: qkv projection -------------------------------------------
    qkv = pl.pallas_call(
        _qkv_proj_kernel,
        out_shape=jax.ShapeDtypeStruct((B, S, 3 * H), jnp.bfloat16),
        grid_spec=pltpu.PrefetchScalarGridSpec(
            num_scalar_prefetch=0,
            grid=(B, S // tm),
            in_specs=[
                pl.BlockSpec((1, tm, H), lambda b, i: (b, i, 0)),        # x
                pl.BlockSpec((H, 3 * H), lambda b, i: (0, 0)),           # w_qkv
                pl.BlockSpec((1, 3 * H), lambda b, i: (0, 0)),           # b_qkv
            ],
            out_specs=pl.BlockSpec((1, tm, 3 * H), lambda b, i: (b, i, 0)),
        ),
        compiler_params=cp2,
    )(x_bf, prepped["w_qkv"], prepped["b_qkv"])

    # ---- head-major q/k/v layout (wrapper-side plumbing) ---------------------
    # TODO(synk): fold this remaining (B,S,3H) relayout into the kernels too
    # (blocked per-head reads of the qkv slab) to drop one more HBM round trip.
    qkv = qkv.reshape(B, S, 3, n_head, hd)
    qkv = jnp.transpose(qkv, (2, 0, 3, 1, 4))            # (3, B, n_head, S, hd)
    q = qkv[0].reshape(B * n_head, S, hd)
    k = qkv[1].reshape(B * n_head, S, hd)
    v = qkv[2].reshape(B * n_head, S, hd)

    # ---- stage 2: triangular causal flash attention --------------------------
    tq = tk = _tile(S, 256)
    # Diagonal-tile finalize & the "no fully-masked row" guarantee need tq == tk.
    assert tq == tk and S % tq == 0
    nq = S // tq
    pairs = [(qi, ki) for qi in range(nq) for ki in range(qi + 1)]
    qi_tbl = jnp.asarray([p[0] for p in pairs], jnp.int32)
    ki_tbl = jnp.asarray([p[1] for p in pairs], jnp.int32)
    h_blk = _head_block(B * n_head)

    ctx = pl.pallas_call(
        _flash_attn_kernel,
        out_shape=jax.ShapeDtypeStruct((B * n_head, S, hd), jnp.bfloat16),
        grid_spec=pltpu.PrefetchScalarGridSpec(
            num_scalar_prefetch=2,
            grid=(B * n_head // h_blk, len(pairs)),
            in_specs=[
                pl.BlockSpec((h_blk, tq, hd),
                             lambda bh, t, qt, kt: (bh, qt[t], 0)),      # q
                pl.BlockSpec((h_blk, tk, hd),
                             lambda bh, t, qt, kt: (bh, kt[t], 0)),      # k
                pl.BlockSpec((h_blk, tk, hd),
                             lambda bh, t, qt, kt: (bh, kt[t], 0)),      # v
            ],
            out_specs=pl.BlockSpec((h_blk, tq, hd),
                                   lambda bh, t, qt, kt: (bh, qt[t], 0)),
            scratch_shapes=[
                pltpu.VMEM((h_blk, tq, 1), jnp.float32),    # running max m
                pltpu.VMEM((h_blk, tq, 1), jnp.float32),    # running denom l
                pltpu.VMEM((h_blk, tq, hd), jnp.float32),   # running numerator
            ],
        ),
        compiler_params=pltpu.CompilerParams(
            dimension_semantics=("parallel", "arbitrary"),
            vmem_limit_bytes=vmem_limit),
    )(qi_tbl, ki_tbl, q, k, v)

    # Free reshape only (no HBM transpose): stage 3 consumes head-major ctx.
    ctx = ctx.reshape(B, n_head, S, hd)

    # ---- stage 3: output projection + bias (+ add_tensor) --------------------
    has_add = add_tensor is not None
    in_specs = [
        pl.BlockSpec((1, n_head, tm, hd), lambda b, i: (b, 0, i, 0)),    # ctx
        pl.BlockSpec((n_head, hd, H), lambda b, i: (0, 0, 0)),           # w_proj
        pl.BlockSpec((1, H), lambda b, i: (0, 0)),                       # b_proj
    ]
    operands = [ctx, prepped["w_proj_h"], prepped["b_proj"]]
    if has_add:   # no zero-tensor DMA when add_tensor is None
        in_specs.append(pl.BlockSpec((1, tm, H), lambda b, i: (b, i, 0)))
        operands.append(add_tensor.astype(jnp.float32))

    out = pl.pallas_call(
        partial(_out_proj_kernel, n_head=n_head, has_add=has_add),
        out_shape=jax.ShapeDtypeStruct((B, S, H), x.dtype),
        grid_spec=pltpu.PrefetchScalarGridSpec(
            num_scalar_prefetch=0,
            grid=(B, S // tm),
            in_specs=in_specs,
            out_specs=pl.BlockSpec((1, tm, H), lambda b, i: (b, i, 0)),
        ),
        compiler_params=cp2,
    )(*operands)

    activations = out  # AttnWrapper: self.activations = output[0]
    return out, activations


def _reference(x, params, add_tensor):
    """Pure-JAX f32 reference for a correctness check."""
    B, S, H = x.shape
    n_head = params["n_head"]
    hd = H // n_head
    qkv = x @ params["w_qkv"] + params["b_qkv"][0]
    q, k, v = qkv[..., :H], qkv[..., H:2 * H], qkv[..., 2 * H:]

    def split(t):  # (B,S,H) -> (B,nh,S,hd)
        return t.reshape(B, S, n_head, hd).transpose(0, 2, 1, 3)

    q, k, v = split(q), split(k), split(v)
    scores = jnp.einsum("bhqd,bhkd->bhqk", q, k) / math.sqrt(hd)
    causal = jnp.tril(jnp.ones((S, S), bool))
    scores = jnp.where(causal, scores, jnp.finfo(jnp.float32).min)
    p = jax.nn.softmax(scores, axis=-1)
    ctx = jnp.einsum("bhqk,bhkd->bhqd", p, v)
    ctx = ctx.transpose(0, 2, 1, 3).reshape(B, S, H)
    out = ctx @ params["w_proj"] + params["b_proj"][0]
    return out + add_tensor


if __name__ == "__main__":
    B, S, H, N_HEAD = 2, 8, 32, 4

    key = jax.random.PRNGKey(0)
    k_x, k_wqkv, k_bqkv, k_wp, k_bp, k_add = jax.random.split(key, 6)

    x = jax.random.normal(k_x, (B, S, H), jnp.float32)
    params = {
        "n_head": N_HEAD,
        "w_qkv": 0.02 * jax.random.normal(k_wqkv, (H, 3 * H), jnp.float32),
        "b_qkv": 0.01 * jax.random.normal(k_bqkv, (1, 3 * H), jnp.float32),
        "w_proj": 0.02 * jax.random.normal(k_wp, (H, H), jnp.float32),
        "b_proj": 0.01 * jax.random.normal(k_bp, (1, H), jnp.float32),
    }
    add_tensor = 0.1 * jax.random.normal(k_add, (B, S, H), jnp.float32)

    # One-time weight prep (hoisted out of the forward pass).
    prepped = prepare_attn_params(params)

    # add_tensor path (the AttnWrapper residual hook).
    out, activations = attn_wrapper_forward(x, prepped, add_tensor)
    out = jax.block_until_ready(out)
    ref = _reference(x, params, add_tensor)
    assert out.shape == (B, S, H)
    assert out.dtype == x.dtype
    # bf16 MXU operands (f32 accumulation / f32 softmax) -> loosened tolerance.
    assert jnp.allclose(out, ref, atol=2e-2, rtol=2e-2), "mismatch (add path)"
    assert jnp.array_equal(out, activations)

    # add_tensor=None path: compiles a kernel variant without the add input.
    out2, _ = attn_wrapper_forward(x, prepped, None)
    out2 = jax.block_until_ready(out2)
    ref2 = _reference(x, params, jnp.zeros_like(x))
    assert jnp.allclose(out2, ref2, atol=2e-2, rtol=2e-2), "mismatch (no-add path)"

    print("KERNEL_OK")
</pallas_src>

<mosaic_0001>
module attributes {stable_mosaic.version = 11 : i64} {
  func.func @_qkv_proj_kernel(%arg0: i32, %arg1: i32, %arg2: memref<1x8x32xbf16, #tpu.memory_space<vmem>>, %arg3: memref<32x96xbf16, #tpu.memory_space<vmem>>, %arg4: memref<1x96xf32, #tpu.memory_space<vmem>>, %arg5: memref<1x8x96xbf16, #tpu.memory_space<vmem>>) attributes {dimension_semantics = [#tpu.dimension_semantics<parallel>, #tpu.dimension_semantics<parallel>], iteration_bounds = array<i64: 2, 1>, scalar_prefetch = 0 : i64, scratch_operands = 0 : i64, tpu.core_type = #tpu.core_type<tc>, window_params = [{transform_indices = @transform_0, window_bounds = array<i64: 1, 8, 32>}, {pipeline_mode = #tpu.pipeline_mode<synchronous>, transform_indices = @transform_1, window_bounds = array<i64: 32, 96>}, {pipeline_mode = #tpu.pipeline_mode<synchronous>, transform_indices = @transform_2, window_bounds = array<i64: 1, 96>}, {transform_indices = @transform_3, window_bounds = array<i64: 1, 8, 96>}]} {
    %c0 = arith.constant 0 : index
    %c0_0 = arith.constant 0 : index
    %c0_1 = arith.constant 0 : index
    %0 = vector.load %arg2[%c0, %c0_0, %c0_1] : memref<1x8x32xbf16, #tpu.memory_space<vmem>>, vector<1x8x32xbf16>
    %1 = vector.shape_cast %0 : vector<1x8x32xbf16> to vector<8x32xbf16>
    %c0_2 = arith.constant 0 : index
    %c0_3 = arith.constant 0 : index
    %2 = vector.load %arg3[%c0_2, %c0_3] : memref<32x96xbf16, #tpu.memory_space<vmem>>, vector<32x96xbf16>
    %cst = arith.constant dense<0.000000e+00> : vector<8x96xf32>
    %3 = tpu.matmul %1, %2, %cst {dimension_numbers = #tpu.dot_dimension_numbers<[1], [0], [0], [1], [0, 0, 1, 1], [], []>} : vector<8x32xbf16>, vector<32x96xbf16>, vector<8x96xf32> -> vector<8x96xf32>
    %c0_4 = arith.constant 0 : index
    %c0_5 = arith.constant 0 : index
    %4 = vector.load %arg4[%c0_4, %c0_5] : memref<1x96xf32, #tpu.memory_space<vmem>>, vector<1x96xf32>
    %5 = vector.shape_cast %4 : vector<1x96xf32> to vector<96xf32>
    %6 = vector.shape_cast %5 : vector<96xf32> to vector<1x96xf32>
    %7 = vector.broadcast %6 : vector<1x96xf32> to vector<8x96xf32>
    %8 = arith.addf %3, %7 : vector<8x96xf32>
    %9 = arith.truncf %8 : vector<8x96xf32> to vector<8x96xbf16>
    %c0_6 = arith.constant 0 : index
    %c0_7 = arith.constant 0 : index
    %c0_8 = arith.constant 0 : index
    %10 = vector.load %arg5[%c0_6, %c0_7, %c0_8] : memref<1x8x96xbf16, #tpu.memory_space<vmem>>, vector<1x8x96xbf16>
    %11 = vector.shape_cast %10 : vector<1x8x96xbf16> to vector<8x96xbf16>
    %12 = vector.shape_cast %9 : vector<8x96xbf16> to vector<1x8x96xbf16>
    tpu.vector_store %arg5[%c0_6, %c0_7, %c0_8], %12 {strides = array<i32>} : memref<1x8x96xbf16, #tpu.memory_space<vmem>>, vector<1x8x96xbf16>,
    return
  }
  func.func @transform_0(%arg0: i32, %arg1: i32) -> (i32, i32, i32) {
    %c0_i32 = arith.constant 0 : i32
    %c0_i32_0 = arith.constant 0 : i32
    return %arg0, %arg1, %c0_i32 : i32, i32, i32
  }
  func.func @transform_1(%arg0: i32, %arg1: i32) -> (i32, i32) {
    %c0_i32 = arith.constant 0 : i32
    %c0_i32_0 = arith.constant 0 : i32
    %c0_i32_1 = arith.constant 0 : i32
    return %c0_i32, %c0_i32_0 : i32, i32
  }
  func.func @transform_2(%arg0: i32, %arg1: i32) -> (i32, i32) {
    %c0_i32 = arith.constant 0 : i32
    %c0_i32_0 = arith.constant 0 : i32
    %c0_i32_1 = arith.constant 0 : i32
    return %c0_i32, %c0_i32_0 : i32, i32
  }
  func.func @transform_3(%arg0: i32, %arg1: i32) -> (i32, i32, i32) {
    %c0_i32 = arith.constant 0 : i32
    %c0_i32_0 = arith.constant 0 : i32
    return %arg0, %arg1, %c0_i32 : i32, i32, i32
  }
}

</mosaic_0001>

<bundles_post_ra>
// kernel: tpu_custom_call.1
= control target key start
LH: loop header
LB: loop body
LE: loop exit
PB: predicated region body
PF: predicated region fallthrough
CT: control target
= control target key end

     0   :  { %8 = vsyncpa [#allocation3], 0  ;;  %s990_s0 = inlined_call_operand.hbm [shape: bf16[2,8,32], index: 0, kind: input, shape index: {}]   ;;  %s991_s1 = inlined_call_operand.hbm [shape: bf16[32,96], index: 1, kind: input, shape index: {}]   ;;  %s992_s2 = inlined_call_operand.hbm [shape: f32[1,96], index: 2, kind: input, shape index: {}]   ;;  %s993_s3 = inlined_call_operand.hbm [shape: bf16[2,8,96], index: 3, kind: output, shape index: {}]  }
   0x1   :  { %10 = vsyncpa [#allocation3 + $0x1], 0 }
   0x2   :  { %11 = vsyncpa [#allocation6], 0 }
   0x3   :  { %12 = vsyncpa [#allocation4], 0 }
   0x4   :  { %14 = vsyncpa [#allocation4 + $0x1], 0  ;;  %s739_s12 = smov 0   ;;  %s741_s13 = smov 0  }
   0x5   :  { %s743_s14 = smov 0   ;;  %s745_s15 = smov 0  }
   0x6   :  { %s747_s16 = smov 0   ;;  %s749_s17 = smov 0  }
   0x7 LB: > { %s416_s18 = sadd.s32 4294967295, %s709_s17   ;;  %s417_s19 = sadd.s32 4294967294, %s709_s17   ;;  %s709_s17 = sphi %s749_s17, %s20_s17   ;;  %s705_s16 = sphi %s747_s16, %s1015_s16   ;;  %s701_s15 = sphi %s745_s15, %s1014_s15   ;;  %s697_s14 = sphi %s743_s14, %s1013_s14   ;;  %s693_s13 = sphi %s741_s13, %s1012_s13   ;;  %s689_s12 = sphi %s739_s12, %s1011_s12  }
   0x8   : > { %p54_p0 = scmp.ne.s32.totalorder %s693_s13, %s689_s12  ;;  %p773_p1 = scmp.eq.s32.totalorder %s416_s18, 0 }
   0x9   : > { %p777_p2 = scmp.eq.s32.totalorder %s416_s18, 1  ;;  %p128_p3 = scmp.eq.s32.totalorder %s417_s19, 1 }
   0xa   : > { %s998_s20 = scalar_select %p773_p1, 1, 0 }
   0xb   : > { %p783_p4 = por %p773_p1, %p54_p0  ;;  %p418_p5 = scmp.ge.s32.totalorder %s709_s17, 1 }
   0xc   : > { %p788_p6 = por %p128_p3, %p54_p0  ;;  %p135_p7 = scmp.lt.s32.totalorder %s709_s17, 3 }
   0xd   : > { %s1000_s22 = scalar_select %p783_p4, 1, 0 }
   0xe   : > { %s1001_s23 = scalar_select %p788_p6, 1, 0 }
   0xf   : > { %p793_p8 = pnand %p418_p5, %p135_p7  ;;  %s711_s25 = smov [#allocation5]  }
  0x10   : > { %s147_s26 = sshll.u32 %s711_s25, 4  ;;  %s712_s28 = smov [#allocation7]   ;;  %s797_s26 = int_to_ptr.vmem [resolvable:$true] %s147_s26 }
  0x11   : > { %p460_p9 = pneg %p793_p8  ;;  %s161_s29 = sshll.u32 %s712_s28, 4  ;;  %s808_s29 = int_to_ptr.vmem [resolvable:$true] %s161_s29 }
  0x12   : > { %s537_s5 = scalar_lea.hbm %s991_s1, 256 }
  0x13   : > { %p804_p11 = pnand %p460_p9, %p773_p1  ;;  %p538_p12 = scmp.ne.s32.totalorder %s991_s1, %s537_s5 }
  0x14   : > { %p544_p5 = scmp.lt.u32.totalorder %s537_s5, %s991_s1 }
  0x15   : > { %p539_p13 = pneg %p804_p11 }
  0x17   : > { %p540_p0 = pnand %p539_p13, %p538_p12 }
  0x19   : > { %p541_p3 = pneg %p540_p0 }
  0x1b   : > { %p546_p7 = pnand %p544_p5, %p541_p3 }
  0x1d   : > { %549 = shalt.err (!%p546_p7)
}
  0x1e   : > { %s550_s10 = scalar_lea.vmem %s797_s26, 256  ;;  %p558_p1 = scmp.lt.s32.totalorder %s797_s26, %s797_s26 }
  0x1f   : > { %p551_p9 = scmp.ne.s32.totalorder %s797_s26, %s550_s10  ;;  %p559_p12 = scmp.lt.s32.totalorder %s550_s10, %s550_s10 }
  0x21   : > { %p553_p10 = pnand %p551_p9, %p539_p13  ;;  %p560_p0 = por %p559_p12, %p558_p1 }
  0x23   : > { %p554_p6 = pneg %p553_p10 }
  0x25   : > { %p561_p4 = pnand %p560_p0, %p554_p6 }
  0x27   : > { %564 = shalt.err (!%p561_p4)
}
  0x28   : > { %s713_s11 = smov 64   ;;  %s714_s18 = smov 4  }
  0x29   : > { %463 = dma.hbm_to_vmem [thread:$0]  (!%p804_p11), %s991_s1, 256, %s797_s26, [#allocation6], %s713_s11, %s713_s11, %s714_s18  }
  0x2a   : > { %s565_s4 = scalar_lea.hbm %s992_s2, 16 }
  0x2b   : > { %p566_p1 = scmp.ne.s32.totalorder %s992_s2, %s565_s4  ;;  %p572_p10 = scmp.lt.u32.totalorder %s565_s4, %s992_s2 }
  0x2d   : > { %p568_p4 = pnand %p566_p1, %p539_p13 }
  0x2f   : > { %p569_p6 = pneg %p568_p4 }
  0x31   : > { %p574_p3 = pnand %p572_p10, %p569_p6 }
  0x33   : > { %577 = shalt.err (!%p574_p3)
}
  0x34   : > { %s578_s26 = scalar_lea.vmem %s808_s29, 16  ;;  %s585_s9 = scalar_lea.vmem %s808_s29, 32 }
  0x35   : > { %p579_p5 = scmp.ne.s32.totalorder %s808_s29, %s578_s26  ;;  %p586_p12 = scmp.lt.s32.totalorder %s808_s29, %s808_s29 }
  0x36   : > { %p587_p0 = scmp.lt.s32.totalorder %s585_s9, %s578_s26 }
  0x37   : > { %p581_p7 = pnand %p579_p5, %p539_p13 }
  0x38   : > { %p588_p1 = por %p587_p0, %p586_p12 }
  0x39   : > { %p582_p9 = pneg %p581_p7 }
  0x3b   : > { %p589_p4 = pnand %p588_p1, %p582_p9 }
  0x3d   : > { %592 = shalt.err (!%p589_p4)
}
  0x3e   : > { %466 = dma.hbm_to_vmem [thread:$0]  (!%p804_p11), %s992_s2, 16, %s808_s29, [#allocation6]  }
  0x3f   : > { %s32_s18 = sadd.s32 1, %s705_s16  ;;  %s41_s19 = sadd.s32 1, %s697_s14 }
  0x40   : > { %p34_p13 = scmp.ge.s32.totalorder %s32_s18, 2  ;;  %p48_p6 = scmp.ne.s32.totalorder %s697_s14, %s693_s13 }
  0x41   : > { %p49_p10 = scmp.eq.s32.totalorder %s709_s17, 0  ;;  %p477_p3 = scmp.lt.s32.totalorder %s709_s17, 2 }
  0x42   : > { %s1017_s18 = smov (%p34_p13, %s32_s18), 0  ;;  %p873_p7 = por %p777_p2, %p48_p6 }
  0x43   : > { %p50_p5 = por %p49_p10, %p48_p6  ;;  %s36_s25 = ssub.s32 %s705_s16, %s1017_s18 }
  0x44   : > { %s1004_s27 = scalar_select %p873_p7, 1, 0 }
  0x45   : > { %s172_s28 = sand.u32 1, %s697_s14   ;;  %p39_p9 = scmp.eq.s32.totalorder %s36_s25, 0 }
  0x46   : > { %s422_s29 = sshll.u32 %s172_s28, 2  ;;  %s423_s30 = sshll.u32 %s705_s16, 6 }
  0x47   : > { %s882_s4 = scalar_select %p39_p9, %s697_s14, %s41_s19  }
  0x48   : > { %s887_s7 = scalar_lea.hbm %s990_s0, %s423_s30  ;;  %s176_s21 = scalar_lea.vmem [#allocation2], %s422_s29 }
  0x49   : > { %s184_s8 = sshll.u32 %s176_s21, 4  ;;  %p891_p2 = pnand %p477_p3, %p50_p5  ;;  %s895_s8 = int_to_ptr.vmem [resolvable:$true] %s184_s8 }
  0x4a   : > { %s173_s9 = scalar_lea.sflag [#allocation3], %s172_s28  ;;  %s593_s10 = scalar_lea.hbm %s887_s7, 64 }
  0x4b   : > { %p594_p11 = scmp.ne.s32.totalorder %s887_s7, %s593_s10  ;;  %p595_p12 = pneg %p891_p2 }
  0x4c   : > { %s598_s25 = scalar_lea.hbm %s990_s0, 128  ;;  %p599_p4 = scmp.lt.u32.totalorder %s887_s7, %s990_s0 }
  0x4d   : > { %p596_p0 = pnand %p595_p12, %p594_p11  ;;  %p600_p13 = scmp.lt.u32.totalorder %s598_s25, %s593_s10 }
  0x4e   : > { %p602_p10 = scmp.lt.u32.totalorder %s593_s10, %s887_s7 }
  0x4f   : > { %p597_p1 = pneg %p596_p0  ;;  %p601_p6 = por %p600_p13, %p599_p4 }
  0x51   : > { %p603_p3 = por %p602_p10, %p601_p6 }
  0x53   : > { %p604_p5 = pnand %p603_p3, %p597_p1 }
  0x55   : > { %607 = shalt.err (!%p604_p5)
}
  0x56   : > { %s608_s28 = scalar_lea.vmem %s895_s8, 64  ;;  %s715_s5 = smov [#allocation2]  }
  0x57   : > { %p609_p9 = scmp.ne.s32.totalorder %s895_s8, %s608_s28  ;;  %s613_s6 = sshll.u32 %s715_s5, 4  ;;  %s614_s6 = int_to_ptr.vmem [resolvable:$false] %s613_s6 }
  0x58   : > { %s615_s21 = scalar_lea.vmem %s614_s6, 128  ;;  %p616_p7 = scmp.lt.s32.totalorder %s895_s8, %s614_s6 }
  0x59   : > { %p611_p11 = pnand %p609_p9, %p595_p12  ;;  %p617_p4 = scmp.lt.s32.totalorder %s615_s21, %s608_s28 }
  0x5b   : > { %p612_p0 = pneg %p611_p11  ;;  %p618_p13 = por %p617_p4, %p616_p7 }
  0x5d   : > { %p619_p6 = pnand %p618_p13, %p612_p0 }
  0x5f   : > { %622 = shalt.err (!%p619_p6)
}
  0x60   : > { %470 = dma.hbm_to_vmem [thread:$0]  (!%p891_p2), %s887_s7, 64, %s895_s8, %s173_s9  }
  0x61   : > { %193 = sbr.rel (%p793_p8) target bundleno = 347 (0x15b), region = 32  ;;  %s925_s10 = sand.u32 (!%p793_p8), 1, %s693_s13  }
  0x62   : > { %s425_s11 = sshll.u32 (!%p793_p8), %s925_s10, 2  ;;  %s196_s19 = scalar_lea.sflag (!%p793_p8), [#allocation3], %s925_s10 }
  0x63   : > { %s199_s25 = scalar_lea.vmem (!%p793_p8), [#allocation2], %s425_s11  ;;  %p1006_p7 = scmp.ne.s32.totalorder (!%p793_p8), %s1000_s22, 0 }
  0x68   : > { %676 = dma.done.wait (%p1006_p7), %s196_s19, 64  }
  0x69   : > { %678 = vsyncadd (%p1006_p7), %s196_s19, 4294967232  ;;  %p1007_p12 = scmp.ne.s32.totalorder %s998_s20, 0 }
  0x6b   : > { %680 = dma.done.wait (%p1007_p12), [#allocation6], 272  }
  0x6c   : > { %682 = vsyncadd (%p1007_p12), [#allocation6], 4294967024  ;;  %v716_v0 = vmov 0.0   ;;  %vm717_vm0 = vmmov 0   ;;  %v535_v1 = vld [vmem:[#allocation5] sm:$0xff]   ;;  %v536_v2 = vld [vmem:[#allocation5 + $0x8] sm:$0xff]  }
  0x6d   : > { %440 = vmatprep.subr.bf16.mxu0 %v716_v0  ;;  %444 = vmatprep.mubr.msk.bf16.mxu0 %vm717_vm0, %v716_v0  ;;  %v231_v3 = vld [vmem:[%s199_s25] sm:$0xf]  ;;  %vm255_vm1 = vcmask 261120   ;;  %v429_v4 = vld [vmem:[#allocation7] ss:$0 sm:$0xff]  ;;  %s434_s22 = sshll.u32 %s701_s15, 6 }
  0x6e   : > { %441 = vmatpush3.bf16.msra.mxu0 %v535_v1  ;;  %s229_s20 = scalar_lea.vmem [#allocation8], %s425_s11  ;;  %vm300_vm2 = vcmask 781312   ;;  %s941_s26 = scalar_lea.hbm %s993_s3, %s434_s22 }
  0x6f   : > { %442 = vmatprep.subr.bf16.mxu0 %v716_v0  ;;  %s317_s24 = sshll.u32 %s229_s20, 4  ;;  %s303_s15 = scalar_lea.sflag [#allocation4], %s925_s10  ;;  %s943_s24 = int_to_ptr.vmem [resolvable:$true] %s317_s24 }
  0x70   : > { %s623_s9 = scalar_lea.vmem %s943_s24, 64  ;;  %p1008_p2 = scmp.ne.s32.totalorder %s1004_s27, 0 }
  0x71   : > { %p624_p8 = scmp.ne.s32.totalorder %s943_s24, %s623_s9  ;;  %s718_s29 = smov [#allocation8]  }
  0x72   : > { %443 = vmatpush3.bf16.msra.mxu0 %v536_v2  ;;  %s627_s30 = sshll.u32 %s718_s29, 4  ;;  %s628_s30 = int_to_ptr.vmem [resolvable:$false] %s627_s30 }
  0x73   : > { %p625_p1 = pnand %p624_p8, %p1008_p2  ;;  %s629_s28 = scalar_lea.vmem %s628_s30, 128 }
  0x74   : > { %p630_p3 = scmp.lt.s32.totalorder %s943_s24, %s628_s30  ;;  %p631_p5 = scmp.lt.s32.totalorder %s629_s28, %s623_s9 }
  0x75   : > { %445 = vmatmul.mubr.msk.bf16.vlgmr.msra.gmra.mrb[0].mxu0 %vm255_vm1, %v231_v3  ;;  %p626_p10 = pneg %p625_p1 }
  0x76   : > { %p632_p9 = por %p631_p5, %p630_p3 }
  0x78   : > { %p633_p11 = pnand %p632_p9, %p626_p10 }
 0x148   : > { %v293_v5 = vpop.f32.mrb[0].mxu0 }
 0x149   : > { %v294_v6 = vadd.f32 %v429_v4, %v293_v5  ;;  %v446_v7 = vpop.f32.mrb[1].mxu0 }
 0x14a   : > { %v296_v8 = vpop.f32.mrb[2].mxu0 }
 0x14b   : > { %v299_v9 = vpack.c.bf16 %v294_v6, %v294_v6  ;;  %v447_v10 = vpop.f32.mrb[3].mxu0 }
 0x14d   : > { %301 = vst.msk [vmem:[%s229_s20] sm:$0xf] %vm300_vm2, %v299_v9 }
 0x14e   : > { %636 = shalt.err (!%p633_p11)
}
 0x14f   : > { %s637_s5 = scalar_lea.hbm %s941_s26, 64  ;;  %s641_s10 = scalar_lea.hbm %s993_s3, 128 }
 0x150   : > { %p638_p0 = scmp.ne.s32.totalorder %s941_s26, %s637_s5  ;;  %p642_p6 = scmp.lt.u32.totalorder %s941_s26, %s993_s3 }
 0x151   : > { %p643_p7 = scmp.lt.u32.totalorder %s641_s10, %s637_s5  ;;  %p645_p8 = scmp.lt.u32.totalorder %s637_s5, %s941_s26 }
 0x152   : > { %p639_p4 = pnand %p638_p0, %p1008_p2 }
 0x153   : > { %p644_p12 = por %p643_p7, %p642_p6 }
 0x154   : > { %p640_p13 = pneg %p639_p4 }
 0x155   : > { %p646_p1 = por %p645_p8, %p644_p12 }
 0x157   : > { %p647_p10 = pnand %p646_p1, %p640_p13 }
 0x159   : > { %650 = shalt.err (!%p647_p10)
}
 0x15a   : > { %458 = dma.vmem_to_hbm [thread:$0]  (%p1008_p2), %s943_s24, 64, %s941_s26, %s303_s15  }
 0x15b PF: > { %s329_s25 = sand.u32 1, %s689_s12   ;;  %p1009_p3 = scmp.ne.s32.totalorder %s1001_s23, 0 }
 0x15c   : > { %p1010_p5 = scmp.ge.s32.totalorder %s709_s17, 2  ;;  %s330_s22 = scalar_lea.sflag [#allocation4], %s329_s25 }
 0x15e   : > { %p472_p9 = pnand %p1010_p5, %p1009_p3 }
 0x160   : > { %684 = dma.done.wait (!%p472_p9), %s330_s22, 64  }
 0x161   : > { %686 = vsyncadd (!%p472_p9), %s330_s22, 4294967232  ;;  %s20_s17 = sadd.s32 1, %s709_s17   ;;  %s1011_s12 = smov %s693_s13 }
 0x162   : > { %p17_p11 = scmp.ge.s32.totalorder %s20_s17, 4   ;;  %s1012_s13 = smov %s697_s14 }
 0x163   : > { %s1013_s14 = smov %s882_s4  ;;  %s1014_s15 = smov %s705_s16 }
 0x164   : > { %s1015_s16 = smov %s1017_s18  ;;  %19 = sbr.rel (!%p17_p11) target bundleno = 7 (0x7), region = 85 }
 0x16b   :  { %335 = vsyncpa [#allocation3], 1 }
 0x16c   :  { %337 = vsyncpa [#allocation3 + $0x1], 1 }
 0x16d   :  { %338 = vsyncpa [#allocation6], 1 }
 0x16e   :  { %339 = vsyncpa [#allocation4], 1 }
 0x16f   :  { %341 = vsyncpa [#allocation4 + $0x1], 1 }

</bundles_post_ra>
